<compile_context>
chip_gen: v6e
topology: v6e:2x2x1
jax: 0.10.0
libtpu: 0.0.40
codegen_flags: <defaults>
</compile_context>

<pallas_src>
import functools

import jax
import jax.numpy as jnp
from jax.experimental import pallas as pl
from jax.experimental.pallas import tpu as pltpu


# ---------------------------------------------------------------------------
# Fused Pallas kernel: GATConv -> ReLU -> GATConv -> ReLU -> Linear
# ---------------------------------------------------------------------------
def _gat_fused_kernel(x_ref, adjb_ref, lm_ref,
                      w1_ref, ws1_ref, b1_ref,
                      w2_ref, ws2_ref, b2_ref,
                      wc_ref, bc_ref,
                      out_ref, *, heads, out_ch):
    n = adjb_ref.shape[0]
    hc = heads * out_ch
    adj_bias = adjb_ref[...]                  # [N, N] f32 additive mask (0 / -1e30)
    lm = lm_ref[...]                          # [H, HC] f32 head-block lane mask

    def gat_layer(x_bf, wext_ref, wsrc_ref, b_ref):
        # MXU push 1: per-head features AND dst attention coefficients.
        # W_ext = [W | W @ att_dst_block] precomputed (bf16) in the wrapper.
        xw_ext = jnp.dot(x_bf, wext_ref[...],
                         preferred_element_type=jnp.float32)      # [N, HC+H]
        xw_bf = xw_ext[:, :hc].astype(jnp.bfloat16)               # [N, HC]
        a_dst = xw_ext[:, hc:]                                     # [N, H]

        # MXU push 2: src coefficients already in row orientation [H, N].
        # W_src = W @ att_src_block precomputed (bf16) in the wrapper.
        a_src_t = jax.lax.dot_general(
            wsrc_ref[...], x_bf, (((0,), (1,)), ((), ())),
            preferred_element_type=jnp.float32)                    # [H, N]

        alphas = []
        for h in range(heads):                                     # static unroll
            # e[i, j] = LeakyReLU(<x'_i, a_dst_h> + <x'_j, a_src_h>)
            logits = a_dst[:, h:h + 1] + a_src_t[h:h + 1, :]       # [N, N]
            logits = jnp.maximum(logits, 0.2 * logits)             # LeakyReLU(0.2)
            masked = logits + adj_bias                             # additive mask
            m = jnp.max(masked, axis=1, keepdims=True)
            e = jnp.exp(masked - m)            # masked entries underflow to 0
            s = jnp.sum(e, axis=1, keepdims=True)
            alphas.append(e * pl.reciprocal(s, approx=True))       # [N, N]

        # MXU push 3: all heads' value aggregation in ONE matmul.
        alpha_stack = jnp.concatenate(alphas, axis=0).astype(jnp.bfloat16)  # [H*N, N]
        res = jnp.dot(alpha_stack, xw_bf,
                      preferred_element_type=jnp.float32)          # [H*N, HC]
        # pick the diagonal blocks (head h lives in lanes h*C:(h+1)*C)
        out = res[0:n, :] * lm[0:1, :]
        for h in range(1, heads):
            out = out + res[h * n:(h + 1) * n, :] * lm[h:h + 1, :]
        # bias + fused ReLU ; Dropout(p=0.5) is identity in eval mode
        return jnp.maximum(out + b_ref[...], 0.0)                  # [N, HC]

    h1 = gat_layer(x_ref[...], w1_ref, ws1_ref, b1_ref)            # conv1 + relu
    h2 = gat_layer(h1.astype(jnp.bfloat16), w2_ref, ws2_ref, b2_ref)  # conv2 + relu
    # classifier; output columns padded to 128 lanes (unmasked full-width vst)
    out_ref[...] = (jnp.dot(h2.astype(jnp.bfloat16), wc_ref[...],
                            preferred_element_type=jnp.float32) + bc_ref[...])


# ---------------------------------------------------------------------------
# Wrapper
# ---------------------------------------------------------------------------
_OUT_PAD = 128  # lane-dense classifier output slab


def _att_block(att, heads, out_ch):
    """[H, C] attention vector -> [H*C, H] block matrix.

    (xw @ blk)[i, h] == <xw[i, h*C:(h+1)*C], att[h]> for all heads at once.
    """
    eye = jnp.eye(heads, dtype=att.dtype)
    return (att[:, :, None] * eye[:, None, :]).reshape(heads * out_ch, heads)


def gat_forward(params, x, adj, *, heads, hidden, num_classes):
    n = x.shape[0]
    hc = heads * hidden

    # additive attention mask (kept f32 so exp() returns exact zeros)
    adj_bias = jnp.where(adj > 0, 0.0, -1e30).astype(jnp.float32)

    # head-block lane mask [H, HC]: lm[h, c] = 1 iff lane c belongs to head h
    lm = (jnp.arange(hc)[None, :] // hidden
          == jnp.arange(heads)[:, None]).astype(jnp.float32)

    def layer_weights(w, asrc, adst):
        ad_blk = _att_block(adst, heads, hidden)            # [HC, H]
        as_blk = _att_block(asrc, heads, hidden)            # [HC, H]
        w_ext = jnp.concatenate([w, w @ ad_blk], axis=1)    # [F_in, HC+H]
        w_src = w @ as_blk                                  # [F_in, H]
        return w_ext.astype(jnp.bfloat16), w_src.astype(jnp.bfloat16)

    w1_ext, ws1 = layer_weights(params["w1"], params["asrc1"], params["adst1"])
    w2_ext, ws2 = layer_weights(params["w2"], params["asrc2"], params["adst2"])

    # classifier weights padded so the kernel stores a full 128-lane slab
    wc_p = jnp.zeros((hc, _OUT_PAD), jnp.bfloat16).at[:, :num_classes].set(
        params["wc"].astype(jnp.bfloat16))
    bc_p = jnp.zeros((1, _OUT_PAD), jnp.float32).at[:, :num_classes].set(
        params["bc"])

    vm = pl.BlockSpec(memory_space=pltpu.MemorySpace.VMEM)
    kernel = functools.partial(_gat_fused_kernel, heads=heads, out_ch=hidden)

    out_padded = pl.pallas_call(
        kernel,
        out_shape=jax.ShapeDtypeStruct((n, _OUT_PAD), jnp.float32),
        in_specs=[vm] * 11,
        out_specs=vm,
    )(x.astype(jnp.bfloat16), adj_bias, lm,
      w1_ext, ws1, params["b1"],
      w2_ext, ws2, params["b2"],
      wc_p, bc_p)

    return out_padded[:, :num_classes]


# ---------------------------------------------------------------------------
# Deterministic setup + run
# ---------------------------------------------------------------------------
if __name__ == "__main__":
    N, F_IN, HIDDEN, HEADS, CLASSES, E = 32, 16, 8, 2, 4, 64
    HC = HIDDEN * HEADS

    key = jax.random.PRNGKey(0)
    kx, ke1, ke2, *kp = jax.random.split(key, 14)

    x = jax.random.normal(kx, (N, F_IN), jnp.float32)

    # random directed edges [2, E] (row 0 = src, row 1 = dst)
    src = jax.random.randint(ke1, (E,), 0, N)
    dst = jax.random.randint(ke2, (E,), 0, N)
    edge_index = jnp.stack([src, dst])

    # dense adjacency mask A[i, j] = 1 iff edge j -> i, plus self-loops
    adj = jnp.zeros((N, N), jnp.float32)
    adj = adj.at[edge_index[1], edge_index[0]].set(1.0)
    adj = adj.at[jnp.arange(N), jnp.arange(N)].set(1.0)

    def init(k, shape, scale=0.1):
        return scale * jax.random.normal(k, shape, jnp.float32)

    params = {
        # conv1: F_IN -> HIDDEN per head, HEADS heads (concat)
        "w1":    init(kp[0], (F_IN, HC)),
        "asrc1": init(kp[1], (HEADS, HIDDEN)),
        "adst1": init(kp[2], (HEADS, HIDDEN)),
        "b1":    init(kp[3], (1, HC)),
        # conv2: HC -> HIDDEN per head, HEADS heads (concat)
        "w2":    init(kp[4], (HC, HC)),
        "asrc2": init(kp[5], (HEADS, HIDDEN)),
        "adst2": init(kp[6], (HEADS, HIDDEN)),
        "b2":    init(kp[7], (1, HC)),
        # classifier: HC -> CLASSES
        "wc":    init(kp[8], (HC, CLASSES)),
        "bc":    init(kp[9], (1, CLASSES)),
    }

    out = jax.jit(
        functools.partial(gat_forward, heads=HEADS, hidden=HIDDEN,
                          num_classes=CLASSES)
    )(params, x, adj)
    jax.block_until_ready(out)

    assert out.shape == (N, CLASSES) and out.dtype == jnp.float32
    print("KERNEL_OK")
</pallas_src>

<mosaic_0001>
module attributes {stable_mosaic.version = 11 : i64} {
  func.func @_gat_fused_kernel(%arg0: memref<32x16xbf16, #tpu.memory_space<vmem>>, %arg1: memref<32x32xf32, #tpu.memory_space<vmem>>, %arg2: memref<2x16xf32, #tpu.memory_space<vmem>>, %arg3: memref<16x18xbf16, #tpu.memory_space<vmem>>, %arg4: memref<16x2xbf16, #tpu.memory_space<vmem>>, %arg5: memref<1x16xf32, #tpu.memory_space<vmem>>, %arg6: memref<16x18xbf16, #tpu.memory_space<vmem>>, %arg7: memref<16x2xbf16, #tpu.memory_space<vmem>>, %arg8: memref<1x16xf32, #tpu.memory_space<vmem>>, %arg9: memref<16x128xbf16, #tpu.memory_space<vmem>>, %arg10: memref<1x128xf32, #tpu.memory_space<vmem>>, %arg11: memref<32x128xf32, #tpu.memory_space<vmem>>) attributes {dimension_semantics = [], scalar_prefetch = 0 : i64, scratch_operands = 0 : i64, tpu.core_type = #tpu.core_type<tc>} {
    %c0 = arith.constant 0 : index
    %c0_0 = arith.constant 0 : index
    %0 = vector.load %arg1[%c0, %c0_0] : memref<32x32xf32, #tpu.memory_space<vmem>>, vector<32x32xf32>
    %c0_1 = arith.constant 0 : index
    %c0_2 = arith.constant 0 : index
    %1 = vector.load %arg2[%c0_1, %c0_2] : memref<2x16xf32, #tpu.memory_space<vmem>>, vector<2x16xf32>
    %c0_3 = arith.constant 0 : index
    %c0_4 = arith.constant 0 : index
    %2 = vector.load %arg0[%c0_3, %c0_4] : memref<32x16xbf16, #tpu.memory_space<vmem>>, vector<32x16xbf16>
    %c0_5 = arith.constant 0 : index
    %c0_6 = arith.constant 0 : index
    %3 = vector.load %arg3[%c0_5, %c0_6] : memref<16x18xbf16, #tpu.memory_space<vmem>>, vector<16x18xbf16>
    %cst = arith.constant dense<0.000000e+00> : vector<32x18xf32>
    %4 = tpu.matmul %2, %3, %cst {dimension_numbers = #tpu.dot_dimension_numbers<[1], [0], [0], [1], [0, 0, 1, 1], [], []>} : vector<32x16xbf16>, vector<16x18xbf16>, vector<32x18xf32> -> vector<32x18xf32>
    %5 = vector.extract_strided_slice %4 {offsets = [0, 0], sizes = [32, 16], strides = [1, 1]} : vector<32x18xf32> to vector<32x16xf32>
    %6 = arith.truncf %5 : vector<32x16xf32> to vector<32x16xbf16>
    %7 = vector.extract_strided_slice %4 {offsets = [0, 16], sizes = [32, 2], strides = [1, 1]} : vector<32x18xf32> to vector<32x2xf32>
    %c0_7 = arith.constant 0 : index
    %c0_8 = arith.constant 0 : index
    %8 = vector.load %arg4[%c0_7, %c0_8] : memref<16x2xbf16, #tpu.memory_space<vmem>>, vector<16x2xbf16>
    %cst_9 = arith.constant dense<0.000000e+00> : vector<2x32xf32>
    %9 = tpu.matmul %8, %2, %cst_9 {dimension_numbers = #tpu.dot_dimension_numbers<[0], [1], [1], [0], [0, 1, 1, 0], [], []>} : vector<16x2xbf16>, vector<32x16xbf16>, vector<2x32xf32> -> vector<2x32xf32>
    %10 = vector.extract_strided_slice %7 {offsets = [0, 0], sizes = [32, 1], strides = [1, 1]} : vector<32x2xf32> to vector<32x1xf32>
    %11 = vector.extract_strided_slice %9 {offsets = [0, 0], sizes = [1, 32], strides = [1, 1]} : vector<2x32xf32> to vector<1x32xf32>
    %12 = vector.broadcast %10 : vector<32x1xf32> to vector<32x32xf32>
    %13 = vector.broadcast %11 : vector<1x32xf32> to vector<32x32xf32>
    %14 = arith.addf %12, %13 : vector<32x32xf32>
    %cst_10 = arith.constant 2.000000e-01 : f32
    %15 = vector.broadcast %cst_10 : f32 to vector<32x32xf32>
    %16 = arith.mulf %15, %14 : vector<32x32xf32>
    %17 = arith.maximumf %14, %16 : vector<32x32xf32>
    %18 = arith.addf %17, %0 : vector<32x32xf32>
    %cst_11 = arith.constant dense<0xFF800000> : vector<32xf32>
    %19 = vector.multi_reduction <maximumf>, %18, %cst_11 [1] : vector<32x32xf32> to vector<32xf32>
    %20 = vector.shape_cast %19 : vector<32xf32> to vector<32x1xf32>
    %21 = vector.broadcast %20 : vector<32x1xf32> to vector<32x32xf32>
    %22 = arith.subf %18, %21 : vector<32x32xf32>
    %23 = math.exp %22 : vector<32x32xf32>
    %cst_12 = arith.constant dense<0.000000e+00> : vector<32xf32>
    %24 = vector.multi_reduction <add>, %23, %cst_12 [1] : vector<32x32xf32> to vector<32xf32>
    %25 = vector.shape_cast %24 : vector<32xf32> to vector<32x1xf32>
    %26 = tpu.reciprocal %25 {approx = true} : vector<32x1xf32> -> vector<32x1xf32>
    %27 = vector.broadcast %26 : vector<32x1xf32> to vector<32x32xf32>
    %28 = arith.mulf %23, %27 : vector<32x32xf32>
    %29 = vector.extract_strided_slice %7 {offsets = [0, 1], sizes = [32, 1], strides = [1, 1]} : vector<32x2xf32> to vector<32x1xf32>
    %30 = vector.extract_strided_slice %9 {offsets = [1, 0], sizes = [1, 32], strides = [1, 1]} : vector<2x32xf32> to vector<1x32xf32>
    %31 = vector.broadcast %29 : vector<32x1xf32> to vector<32x32xf32>
    %32 = vector.broadcast %30 : vector<1x32xf32> to vector<32x32xf32>
    %33 = arith.addf %31, %32 : vector<32x32xf32>
    %cst_13 = arith.constant 2.000000e-01 : f32
    %34 = vector.broadcast %cst_13 : f32 to vector<32x32xf32>
    %35 = arith.mulf %34, %33 : vector<32x32xf32>
    %36 = arith.maximumf %33, %35 : vector<32x32xf32>
    %37 = arith.addf %36, %0 : vector<32x32xf32>
    %cst_14 = arith.constant dense<0xFF800000> : vector<32xf32>
    %38 = vector.multi_reduction <maximumf>, %37, %cst_14 [1] : vector<32x32xf32> to vector<32xf32>
    %39 = vector.shape_cast %38 : vector<32xf32> to vector<32x1xf32>
    %40 = vector.broadcast %39 : vector<32x1xf32> to vector<32x32xf32>
    %41 = arith.subf %37, %40 : vector<32x32xf32>
    %42 = math.exp %41 : vector<32x32xf32>
    %cst_15 = arith.constant dense<0.000000e+00> : vector<32xf32>
    %43 = vector.multi_reduction <add>, %42, %cst_15 [1] : vector<32x32xf32> to vector<32xf32>
    %44 = vector.shape_cast %43 : vector<32xf32> to vector<32x1xf32>
    %45 = tpu.reciprocal %44 {approx = true} : vector<32x1xf32> -> vector<32x1xf32>
    %46 = vector.broadcast %45 : vector<32x1xf32> to vector<32x32xf32>
    %47 = arith.mulf %42, %46 : vector<32x32xf32>
    %48 = tpu.concatenate %28, %47 in 0 : vector<32x32xf32>, vector<32x32xf32> -> vector<64x32xf32>
    %49 = arith.truncf %48 : vector<64x32xf32> to vector<64x32xbf16>
    %cst_16 = arith.constant dense<0.000000e+00> : vector<64x16xf32>
    %50 = tpu.matmul %49, %6, %cst_16 {dimension_numbers = #tpu.dot_dimension_numbers<[1], [0], [0], [1], [0, 0, 1, 1], [], []>} : vector<64x32xbf16>, vector<32x16xbf16>, vector<64x16xf32> -> vector<64x16xf32>
    %51 = vector.extract_strided_slice %50 {offsets = [0, 0], sizes = [32, 16], strides = [1, 1]} : vector<64x16xf32> to vector<32x16xf32>
    %52 = vector.extract_strided_slice %1 {offsets = [0, 0], sizes = [1, 16], strides = [1, 1]} : vector<2x16xf32> to vector<1x16xf32>
    %53 = vector.broadcast %52 : vector<1x16xf32> to vector<32x16xf32>
    %54 = arith.mulf %51, %53 : vector<32x16xf32>
    %55 = vector.extract_strided_slice %50 {offsets = [32, 0], sizes = [32, 16], strides = [1, 1]} : vector<64x16xf32> to vector<32x16xf32>
    %56 = vector.extract_strided_slice %1 {offsets = [1, 0], sizes = [1, 16], strides = [1, 1]} : vector<2x16xf32> to vector<1x16xf32>
    %57 = vector.broadcast %56 : vector<1x16xf32> to vector<32x16xf32>
    %58 = arith.mulf %55, %57 : vector<32x16xf32>
    %59 = arith.addf %54, %58 : vector<32x16xf32>
    %c0_17 = arith.constant 0 : index
    %c0_18 = arith.constant 0 : index
    %60 = vector.load %arg5[%c0_17, %c0_18] : memref<1x16xf32, #tpu.memory_space<vmem>>, vector<1x16xf32>
    %61 = vector.broadcast %60 : vector<1x16xf32> to vector<32x16xf32>
    %62 = arith.addf %59, %61 : vector<32x16xf32>
    %cst_19 = arith.constant 0.000000e+00 : f32
    %63 = vector.broadcast %cst_19 : f32 to vector<32x16xf32>
    %64 = arith.maximumf %62, %63 : vector<32x16xf32>
    %65 = arith.truncf %64 : vector<32x16xf32> to vector<32x16xbf16>
    %c0_20 = arith.constant 0 : index
    %c0_21 = arith.constant 0 : index
    %66 = vector.load %arg6[%c0_20, %c0_21] : memref<16x18xbf16, #tpu.memory_space<vmem>>, vector<16x18xbf16>
    %cst_22 = arith.constant dense<0.000000e+00> : vector<32x18xf32>
    %67 = tpu.matmul %65, %66, %cst_22 {dimension_numbers = #tpu.dot_dimension_numbers<[1], [0], [0], [1], [0, 0, 1, 1], [], []>} : vector<32x16xbf16>, vector<16x18xbf16>, vector<32x18xf32> -> vector<32x18xf32>
    %68 = vector.extract_strided_slice %67 {offsets = [0, 0], sizes = [32, 16], strides = [1, 1]} : vector<32x18xf32> to vector<32x16xf32>
    %69 = arith.truncf %68 : vector<32x16xf32> to vector<32x16xbf16>
    %70 = vector.extract_strided_slice %67 {offsets = [0, 16], sizes = [32, 2], strides = [1, 1]} : vector<32x18xf32> to vector<32x2xf32>
    %c0_23 = arith.constant 0 : index
    %c0_24 = arith.constant 0 : index
    %71 = vector.load %arg7[%c0_23, %c0_24] : memref<16x2xbf16, #tpu.memory_space<vmem>>, vector<16x2xbf16>
    %cst_25 = arith.constant dense<0.000000e+00> : vector<2x32xf32>
    %72 = tpu.matmul %71, %65, %cst_25 {dimension_numbers = #tpu.dot_dimension_numbers<[0], [1], [1], [0], [0, 1, 1, 0], [], []>} : vector<16x2xbf16>, vector<32x16xbf16>, vector<2x32xf32> -> vector<2x32xf32>
    %73 = vector.extract_strided_slice %70 {offsets = [0, 0], sizes = [32, 1], strides = [1, 1]} : vector<32x2xf32> to vector<32x1xf32>
    %74 = vector.extract_strided_slice %72 {offsets = [0, 0], sizes = [1, 32], strides = [1, 1]} : vector<2x32xf32> to vector<1x32xf32>
    %75 = vector.broadcast %73 : vector<32x1xf32> to vector<32x32xf32>
    %76 = vector.broadcast %74 : vector<1x32xf32> to vector<32x32xf32>
    %77 = arith.addf %75, %76 : vector<32x32xf32>
    %cst_26 = arith.constant 2.000000e-01 : f32
    %78 = vector.broadcast %cst_26 : f32 to vector<32x32xf32>
    %79 = arith.mulf %78, %77 : vector<32x32xf32>
    %80 = arith.maximumf %77, %79 : vector<32x32xf32>
    %81 = arith.addf %80, %0 : vector<32x32xf32>
    %cst_27 = arith.constant dense<0xFF800000> : vector<32xf32>
    %82 = vector.multi_reduction <maximumf>, %81, %cst_27 [1] : vector<32x32xf32> to vector<32xf32>
    %83 = vector.shape_cast %82 : vector<32xf32> to vector<32x1xf32>
    %84 = vector.broadcast %83 : vector<32x1xf32> to vector<32x32xf32>
    %85 = arith.subf %81, %84 : vector<32x32xf32>
    %86 = math.exp %85 : vector<32x32xf32>
    %cst_28 = arith.constant dense<0.000000e+00> : vector<32xf32>
    %87 = vector.multi_reduction <add>, %86, %cst_28 [1] : vector<32x32xf32> to vector<32xf32>
    %88 = vector.shape_cast %87 : vector<32xf32> to vector<32x1xf32>
    %89 = tpu.reciprocal %88 {approx = true} : vector<32x1xf32> -> vector<32x1xf32>
    %90 = vector.broadcast %89 : vector<32x1xf32> to vector<32x32xf32>
    %91 = arith.mulf %86, %90 : vector<32x32xf32>
    %92 = vector.extract_strided_slice %70 {offsets = [0, 1], sizes = [32, 1], strides = [1, 1]} : vector<32x2xf32> to vector<32x1xf32>
    %93 = vector.extract_strided_slice %72 {offsets = [1, 0], sizes = [1, 32], strides = [1, 1]} : vector<2x32xf32> to vector<1x32xf32>
    %94 = vector.broadcast %92 : vector<32x1xf32> to vector<32x32xf32>
    %95 = vector.broadcast %93 : vector<1x32xf32> to vector<32x32xf32>
    %96 = arith.addf %94, %95 : vector<32x32xf32>
    %cst_29 = arith.constant 2.000000e-01 : f32
    %97 = vector.broadcast %cst_29 : f32 to vector<32x32xf32>
    %98 = arith.mulf %97, %96 : vector<32x32xf32>
    %99 = arith.maximumf %96, %98 : vector<32x32xf32>
    %100 = arith.addf %99, %0 : vector<32x32xf32>
    %cst_30 = arith.constant dense<0xFF800000> : vector<32xf32>
    %101 = vector.multi_reduction <maximumf>, %100, %cst_30 [1] : vector<32x32xf32> to vector<32xf32>
    %102 = vector.shape_cast %101 : vector<32xf32> to vector<32x1xf32>
    %103 = vector.broadcast %102 : vector<32x1xf32> to vector<32x32xf32>
    %104 = arith.subf %100, %103 : vector<32x32xf32>
    %105 = math.exp %104 : vector<32x32xf32>
    %cst_31 = arith.constant dense<0.000000e+00> : vector<32xf32>
    %106 = vector.multi_reduction <add>, %105, %cst_31 [1] : vector<32x32xf32> to vector<32xf32>
    %107 = vector.shape_cast %106 : vector<32xf32> to vector<32x1xf32>
    %108 = tpu.reciprocal %107 {approx = true} : vector<32x1xf32> -> vector<32x1xf32>
    %109 = vector.broadcast %108 : vector<32x1xf32> to vector<32x32xf32>
    %110 = arith.mulf %105, %109 : vector<32x32xf32>
    %111 = tpu.concatenate %91, %110 in 0 : vector<32x32xf32>, vector<32x32xf32> -> vector<64x32xf32>
    %112 = arith.truncf %111 : vector<64x32xf32> to vector<64x32xbf16>
    %cst_32 = arith.constant dense<0.000000e+00> : vector<64x16xf32>
    %113 = tpu.matmul %112, %69, %cst_32 {dimension_numbers = #tpu.dot_dimension_numbers<[1], [0], [0], [1], [0, 0, 1, 1], [], []>} : vector<64x32xbf16>, vector<32x16xbf16>, vector<64x16xf32> -> vector<64x16xf32>
    %114 = vector.extract_strided_slice %113 {offsets = [0, 0], sizes = [32, 16], strides = [1, 1]} : vector<64x16xf32> to vector<32x16xf32>
    %115 = vector.extract_strided_slice %1 {offsets = [0, 0], sizes = [1, 16], strides = [1, 1]} : vector<2x16xf32> to vector<1x16xf32>
    %116 = vector.broadcast %115 : vector<1x16xf32> to vector<32x16xf32>
    %117 = arith.mulf %114, %116 : vector<32x16xf32>
    %118 = vector.extract_strided_slice %113 {offsets = [32, 0], sizes = [32, 16], strides = [1, 1]} : vector<64x16xf32> to vector<32x16xf32>
    %119 = vector.extract_strided_slice %1 {offsets = [1, 0], sizes = [1, 16], strides = [1, 1]} : vector<2x16xf32> to vector<1x16xf32>
    %120 = vector.broadcast %119 : vector<1x16xf32> to vector<32x16xf32>
    %121 = arith.mulf %118, %120 : vector<32x16xf32>
    %122 = arith.addf %117, %121 : vector<32x16xf32>
    %c0_33 = arith.constant 0 : index
    %c0_34 = arith.constant 0 : index
    %123 = vector.load %arg8[%c0_33, %c0_34] : memref<1x16xf32, #tpu.memory_space<vmem>>, vector<1x16xf32>
    %124 = vector.broadcast %123 : vector<1x16xf32> to vector<32x16xf32>
    %125 = arith.addf %122, %124 : vector<32x16xf32>
    %cst_35 = arith.constant 0.000000e+00 : f32
    %126 = vector.broadcast %cst_35 : f32 to vector<32x16xf32>
    %127 = arith.maximumf %125, %126 : vector<32x16xf32>
    %128 = arith.truncf %127 : vector<32x16xf32> to vector<32x16xbf16>
    %c0_36 = arith.constant 0 : index
    %c0_37 = arith.constant 0 : index
    %129 = vector.load %arg9[%c0_36, %c0_37] : memref<16x128xbf16, #tpu.memory_space<vmem>>, vector<16x128xbf16>
    %cst_38 = arith.constant dense<0.000000e+00> : vector<32x128xf32>
    %130 = tpu.matmul %128, %129, %cst_38 {dimension_numbers = #tpu.dot_dimension_numbers<[1], [0], [0], [1], [0, 0, 1, 1], [], []>} : vector<32x16xbf16>, vector<16x128xbf16>, vector<32x128xf32> -> vector<32x128xf32>
    %c0_39 = arith.constant 0 : index
    %c0_40 = arith.constant 0 : index
    %131 = vector.load %arg10[%c0_39, %c0_40] : memref<1x128xf32, #tpu.memory_space<vmem>>, vector<1x128xf32>
    %132 = vector.broadcast %131 : vector<1x128xf32> to vector<32x128xf32>
    %133 = arith.addf %130, %132 : vector<32x128xf32>
    %c0_41 = arith.constant 0 : index
    %c0_42 = arith.constant 0 : index
    %134 = vector.load %arg11[%c0_41, %c0_42] : memref<32x128xf32, #tpu.memory_space<vmem>>, vector<32x128xf32>
    tpu.vector_store %arg11[%c0_41, %c0_42], %133 {strides = array<i32>} : memref<32x128xf32, #tpu.memory_space<vmem>>, vector<32x128xf32>,
    return
  }
}

</mosaic_0001>

<bundles_post_ra>
// kernel: gat_forward.1
= control target key start
LH: loop header
LB: loop body
LE: loop exit
PB: predicated region body
PF: predicated region fallthrough
CT: control target
= control target key end

     0   :  { %vm66_vm0 = vcmask 130048   ;;  %v1153_v1 = vmov 0.0   ;;  %vm1154_vm1 = vmmov 0   ;;  %v1155_v3 = vmov 16   ;;  %s1396_s3 = inlined_call_operand.vmem [shape: bf16[16,18], index: 3, kind: input, shape index: {}]   ;;  %s1397_s0 = inlined_call_operand.vmem [shape: bf16[32,16], index: 0, kind: input, shape index: {}]   ;;  %s1398_s4 = inlined_call_operand.vmem [shape: bf16[16,2], index: 4, kind: input, shape index: {}]   ;;  %s1399_s1 = inlined_call_operand.vmem [shape: f32[32,32], index: 1, kind: input, shape index: {}]   ;;  %s1400_s6 = inlined_call_operand.vmem [shape: bf16[16,18], index: 6, kind: input, shape index: {}]   ;;  %s1401_s7 = inlined_call_operand.vmem [shape: bf16[16,2], index: 7, kind: input, shape index: {}]   ;;  %s1402_s2 = inlined_call_operand.vmem [shape: f32[2,16], index: 2, kind: input, shape index: {}]   ;;  %s1403_s5 = inlined_call_operand.vmem [shape: f32[1,16], index: 5, kind: input, shape index: {}]   ;;  %s1404_s9 = inlined_call_operand.vmem [shape: bf16[16,128], index: 9, kind: input, shape index: {}]   ;;  %s1405_s8 = inlined_call_operand.vmem [shape: f32[1,16], index: 8, kind: input, shape index: {}]   ;;  %s1406_s10 = inlined_call_operand.vmem [shape: f32[1,128], index: 10, kind: input, shape index: {}]   ;;  %s1407_s11 = inlined_call_operand.vmem [shape: f32[32,128], index: 11, kind: output, shape index: {}]  }
   0x1   :  { %v1082_v0 = vld [vmem:[%s1396_s3] sm:$0xff]   ;;  %1017 = vmatprep.subr.bf16.mxu1 %v1153_v1  ;;  %1021 = vmatprep.mubr.msk.bf16.mxu1 %vm1154_vm1, %v1153_v1  ;;  %v1084_v4 = vld [vmem:[%s1397_s0 + $0x8] sm:$0xff]   ;;  %v1156_v15 = vmov 17   ;;  %v211_v20 = vlaneseq  ;;  %v1258_v41 = vld [vmem:[%s1399_s1 + $0x10] sm:$0xff]  ;;  %vm231_vm2 = vcmask 261120  }
   0x2   :  { %v1083_v2 = vld [vmem:[%s1397_s0] sm:$0xff]   ;;  %1074 = vset.pattern.permute.xlu1 %v1155_v3  ;;  %1011 = vmatprep.subr.bf16.mxu0 %v1082_v0  ;;  %v71_v6 = vsel %vm66_vm0, %v1084_v4, 0  ;;  %v1266_v49 = vld [vmem:[%s1399_s1 + $0x8] sm:$0xff]  ;;  %v1271_v50 = vld [vmem:[%s1399_s1 + $0x18] sm:$0xff] }
   0x3   :  { %1012 = vmatpush3.bf16.msra.mxu0 %v1082_v0  ;;  %1013 = vmatprep.mubr.msk.bf16.mxu0 %vm66_vm0, %v1083_v2  ;;  %v1085_v5 = vld [vmem:[%s1398_s4] sm:$0xff]   ;;  %v68_v7 = vsel %vm66_vm0, %v1083_v2, 0  ;;  %v212_v21 = vshrl.u32 %v211_v20, 7 }
   0x4   :  { %132 = vxpose.xlu0.c.b16.start.end [1/1] (short) (narrow) %v1085_v5, 16  ;;  %1018 = vmatpush3.bf16.xpose.msra.mxu1 %v71_v6  ;;  %v1253_v34 = vld [vmem:[%s1399_s1] sm:$0xff] }
   0x5   :  { %1019 = vmatprep.subr.bf16.mxu1 %v1153_v1  ;;  %v1244_v22 = vsub.s32 0, %v212_v21  ;;  %v1247_v26 = vsub.s32 1, %v212_v21 }
   0x6   :  { %1014 = vmatmul.mubr.msk.bf16.vlgmr.msra.gmra.mxu0 %vm66_vm0, %v1084_v4 }
   0xc   :  { %1020 = vmatpush3.bf16.xpose.msra.mxu1 %v68_v7 }
   0xd   :  { %1075 = vset.pattern.permute.xlu0 %v1155_v3 }
  0x66   :  { %v140_v8 = vpop.trf.xlu0 }
  0x67   :  { %1022 = vmatmul.mubr.msk.bf16.vlgmr.msra.gmra.mxu1 %vm66_vm0, %v140_v8 }
  0xc6   :  { %v1015_v9 = vpop.f32.mrf.mxu0 }
  0xc7   :  { %203 = vperm.xlu1 %1074, %v1015_v9  }
  0xc8   :  { %v107_v10 = vpop.f32.mrf.mxu0 }
  0xc9   :  { %193 = vperm.xlu0 %1075, %v107_v10  }
  0xca   :  { %v1016_v11 = vpop.f32.mrf.mxu0 }
  0xcb   :  { %v123_v12 = vpack.c.bf16 %v1016_v11, %v1015_v9  ;;  %208 = vperm.xlu1 %1074, %v1016_v11  }
  0xcc   :  { %v110_v13 = vpop.f32.mrf.mxu0 }
  0xcd   :  { %v122_v14 = vpack.c.bf16 %v110_v13, %v107_v10  ;;  %1077 = vset.pattern.permute.xlu0 %v1156_v15  ;;  %1025 = vmatprep.subr.bf16.mxu0 %v123_v12 }
  0xce   :  { %1026 = vmatpush3.bf16.msra.mxu0 %v123_v12  ;;  %281 = vperm.xlu0 %1077, %v110_v13  }
  0xcf   :  { %198 = vperm.xlu1 %1074, %v110_v13   ;;  %1027 = vmatprep.subr.bf16.mxu0 %v122_v14 }
  0xd2   :  { %1028 = vmatpush3.bf16.msra.mxu0 %v122_v14 }
  0xd3   :  { %1076 = vset.pattern.permute.xlu1 %v1156_v15  ;;  %1043 = vmatprep.subr.bf16.mxu0 %v1153_v1 }
  0xd4   :  { %277 = vperm.xlu1 %1076, %v107_v10  }
  0xd8   :  { %285 = vperm.xlu1 %1076, %v1015_v9  }
  0xdc   :  { %289 = vperm.xlu1 %1076, %v1016_v11  }
  0xe0   :  { %1078 = vset.pattern.permute.xlu1 %v1155_v3 }
 0x127   :  { %v185_v16 = vpop.f32.mrf.mxu1 }
 0x128   :  { %v214_v23 = vrot.slane %v185_v16, %v1244_v22  ;;  %v295_v33 = vrot.slane %v185_v16, %v1247_v26 }
 0x129   :  { %v1023_v17 = vpop.f32.mrf.mxu1 }
 0x12b   :  { %v188_v18 = vpop.f32.mrf.mxu1 }
 0x12d   :  { %v1024_v19 = vpop.f32.mrf.mxu1 }
 0x142   :  { %v204_v24 = vpop.permute.xlu1 %203 }
 0x143   :  { %v217_v25 = vadd.f32 %v214_v23, %v204_v24 }
 0x144   :  { %v194_v27 = vpop.permute.xlu0 %193 }
 0x145   :  { %v221_v28 = vmul.f32 0.2, %v217_v25  ;;  %v215_v29 = vadd.f32 %v214_v23, %v194_v27 }
 0x146   :  { %v209_v30 = vpop.permute.xlu1 %208 }
 0x147   :  { %v219_v31 = vmul.f32 0.2, %v215_v29  ;;  %v218_v32 = vadd.f32 %v214_v23, %v209_v30  ;;  %v225_v35 = vmax.f32 %v217_v25, %v221_v28 }
 0x149   :  { %v223_v36 = vmax.f32 %v215_v29, %v219_v31  ;;  %v222_v37 = vmul.f32 0.2, %v218_v32  ;;  %v282_v38 = vpop.permute.xlu0 %281  ;;  %v229_v48 = vadd.f32 %v225_v35, %v1258_v41 }
 0x14a   :  { %v297_v39 = vadd.f32 %v295_v33, %v282_v38  ;;  %v199_v40 = vpop.permute.xlu1 %198 }
 0x14b   :  { %v216_v42 = vadd.f32 %v214_v23, %v199_v40  ;;  %v227_v43 = vadd.f32 %v223_v36, %v1253_v34  ;;  %v226_v45 = vmax.f32 %v218_v32, %v222_v37  ;;  %v238_v55 = vsel %vm231_vm2, %v229_v48, -inf }
 0x14c   :  { %v301_v44 = vmul.f32 0.2, %v297_v39 }
 0x14d   :  { %v220_v46 = vmul.f32 0.2, %v216_v42  ;;  %v232_v47 = vsel %vm231_vm2, %v227_v43, -inf  ;;  %v230_v57 = vadd.f32 %v226_v45, %v1271_v50 }
 0x14e   :  { %233 = vmax.xlane.f32.xlu0 %v232_v47  ;;  %v305_v51 = vmax.f32 %v297_v39, %v301_v44 }
 0x14f   :  { %v224_v52 = vmax.f32 %v216_v42, %v220_v46  ;;  %v278_v53 = vpop.permute.xlu1 %277  ;;  %v241_v0 = vsel %vm231_vm2, %v230_v57, -inf }
 0x150   :  { %v296_v54 = vadd.f32 %v295_v33, %v278_v53  ;;  %v309_v61 = vadd.f32 %v305_v51, %v1266_v49 }
 0x151   :  { %v228_v56 = vadd.f32 %v224_v52, %v1266_v49 }
 0x152   :  { %v300_v58 = vmul.f32 0.2, %v296_v54  ;;  %239 = vmax.xlane.f32.xlu0 %v238_v55  ;;  %v315_v6 = vsel %vm231_vm2, %v309_v61, -inf }
 0x153   :  { %v286_v59 = vpop.permute.xlu1 %285  ;;  %v235_v60 = vsel %vm231_vm2, %v228_v56, -inf }
 0x154   :  { %v304_v62 = vmax.f32 %v296_v54, %v300_v58  ;;  %v298_v63 = vadd.f32 %v295_v33, %v286_v59  ;;  %236 = vmax.xlane.f32.xlu1 %v235_v60 }
 0x156   :  { %v302_v2 = vmul.f32 0.2, %v298_v63  ;;  %242 = vmax.xlane.f32.xlu0 %v241_v0  ;;  %v308_v4 = vadd.f32 %v304_v62, %v1253_v34 }
 0x157   :  { %v290_v5 = vpop.permute.xlu1 %289 }
 0x158   :  { %v306_v7 = vmax.f32 %v298_v63, %v302_v2  ;;  %v299_v8 = vadd.f32 %v295_v33, %v290_v5  ;;  %316 = vmax.xlane.f32.xlu1 %v315_v6  ;;  %v312_v9 = vsel %vm231_vm2, %v308_v4, -inf }
 0x15a   :  { %v303_v10 = vmul.f32 0.2, %v299_v8  ;;  %313 = vmax.xlane.f32.xlu0 %v312_v9  ;;  %v310_v11 = vadd.f32 %v306_v7, %v1258_v41 }
 0x15c   :  { %v307_v12 = vmax.f32 %v299_v8, %v303_v10  ;;  %v318_v13 = vsel %vm231_vm2, %v310_v11, -inf }
 0x15e   :  { %319 = vmax.xlane.f32.xlu0 %v318_v13  ;;  %v311_v14 = vadd.f32 %v307_v12, %v1271_v50 }
 0x160   :  { %v321_v16 = vsel %vm231_vm2, %v311_v14, -inf }
 0x161   :  { %322 = vmax.xlane.f32.xlu1 %v321_v16 }
 0x1d7   :  { %v234_v17 = vpop.xlane.xlu0 %233 }
 0x1d8   :  { %v244_v18 = vsub.f32 %v227_v43, %v234_v17 }
 0x1da   :  { %v248_v19 = vmul.f32 1.442695, %v244_v18 }
 0x1db   :  { %v240_v20 = vpop.xlane.xlu0 %239 }
 0x1dc   :  { %1089 = vpow2.f32 %v248_v19  ;;  %v246_v21 = vsub.f32 %v229_v48, %v240_v20 }
 0x1dd   :  { %v237_v23 = vpop.xlane.xlu1 %236 }
 0x1de   :  { %v252_v24 = vmul.f32 1.442695, %v246_v21  ;;  %v245_v25 = vsub.f32 %v228_v56, %v237_v23 }
 0x1df   :  { %v243_v27 = vpop.xlane.xlu0 %242 }
 0x1e0   :  { %1091 = vpow2.f32 %v252_v24  ;;  %v250_v28 = vmul.f32 1.442695, %v245_v25  ;;  %v247_v29 = vsub.f32 %v230_v57, %v243_v27 }
 0x1e1   :  { %v317_v30 = vpop.xlane.xlu1 %316 }
 0x1e2   :  { %1093 = vpow2.f32 %v250_v28  ;;  %v254_v31 = vmul.f32 1.442695, %v247_v29  ;;  %v325_v32 = vsub.f32 %v309_v61, %v317_v30 }
 0x1e3   :  { %v314_v33 = vpop.xlane.xlu0 %313 }
 0x1e4   :  { %1095 = vpow2.f32 %v254_v31  ;;  %v330_v35 = vmul.f32 1.442695, %v325_v32  ;;  %v324_v36 = vsub.f32 %v308_v4, %v314_v33  ;;  %v1086_v32 = vld [vmem:[%s1400_s6] sm:$0xff]  }
 0x1e5   :  { %1037 = vmatprep.subr.bf16.mxu1 %v1086_v32  ;;  %v1087_v33 = vld [vmem:[%s1401_s7] sm:$0xff]  }
 0x1e6   :  { %v328_v37 = vmul.f32 1.442695, %v324_v36  ;;  %1097 = vpow2.f32 %v330_v35  ;;  %1038 = vmatpush3.bf16.msra.mxu1 %v1086_v32 }
 0x1e7   :  { %v320_v38 = vpop.xlane.xlu0 %319 }
 0x1e8   :  { %1099 = vpow2.f32 %v328_v37  ;;  %v326_v39 = vsub.f32 %v310_v11, %v320_v38  ;;  %v43_v37 = vld [vmem:[%s1402_s2] sm:$0x3] }
 0x1e9   :  { %v1090_v40 = vpop.eup %1089 }
 0x1ea   :  { %v332_v42 = vmul.f32 1.442695, %v326_v39  ;;  %v323_v43 = vpop.xlane.xlu1 %322  ;;  %v256_v44 = vsel %vm231_vm2, %v1090_v40, 0.0  ;;  %v1310_v39 = vrot.slane %v43_v37, %v1244_v22 }
 0x1eb   :  { %v327_v45 = vsub.f32 %v311_v14, %v323_v43  ;;  %257 = vadd.xlane.f32.xlu0 %v256_v44 }
 0x1ec   :  { %1101 = vpow2.f32 %v332_v42 }
 0x1ed   :  { %v1092_v46 = vpop.eup %1091  ;;  %v334_v47 = vmul.f32 1.442695, %v327_v45 }
 0x1ee   :  { %v262_v48 = vsel %vm231_vm2, %v1092_v46, 0.0 }
 0x1ef   :  { %v1094_v51 = vpop.eup %1093  ;;  %1103 = vpow2.f32 %v334_v47  ;;  %263 = vadd.xlane.f32.xlu0 %v262_v48 }
 0x1f0   :  { %v259_v52 = vsel %vm231_vm2, %v1094_v51, 0.0 }
 0x1f1   :  { %v1096_v53 = vpop.eup %1095  ;;  %260 = vadd.xlane.f32.xlu1 %v259_v52  ;;  %v969_v52 = vld [vmem:[%s1403_s5] ss:$0 sm:$0xff] }
 0x1f2   :  { %v265_v55 = vsel %vm231_vm2, %v1096_v53, 0.0 }
 0x1f3   :  { %v1098_v54 = vpop.eup %1097 }
 0x1f4   :  { %v339_v58 = vsel %vm231_vm2, %v1098_v54, 0.0 }
 0x1f5   :  { %v1100_v56 = vpop.eup %1099  ;;  %266 = vadd.xlane.f32.xlu1 %v265_v55 }
 0x1f6   :  { %v336_v57 = vsel %vm231_vm2, %v1100_v56, 0.0 }
 0x1f7   :  { %337 = vadd.xlane.f32.xlu0 %v336_v57 }
 0x1f9   :  { %v1102_v59 = vpop.eup %1101  ;;  %340 = vadd.xlane.f32.xlu1 %v339_v58 }
 0x1fa   :  { %v342_v60 = vsel %vm231_vm2, %v1102_v59, 0.0 }
 0x1fb   :  { %343 = vadd.xlane.f32.xlu0 %v342_v60 }
 0x1fc   :  { %v1104_v61 = vpop.eup %1103 }
 0x1fd   :  { %v345_v62 = vsel %vm231_vm2, %v1104_v61, 0.0 }
 0x1fe   :  { %346 = vadd.xlane.f32.xlu1 %v345_v62 }
 0x228   :  { %547 = vxpose.xlu0.c.b16.start.end [1/1] (short) (narrow) %v1087_v33, 16 }
 0x274   :  { %v258_v63 = vpop.xlane.xlu0 %257 }
 0x275   :  { %1105 = vrcp.f32 %v258_v63 }
 0x278   :  { %v264_v0 = vpop.xlane.xlu0 %263 }
 0x27a   :  { %v261_v2 = vpop.xlane.xlu1 %260 }
 0x27b   :  { %1107 = vrcp.f32 %v261_v2 }
 0x27c   :  { %1109 = vrcp.f32 %v264_v0 }
 0x27e   :  { %v267_v4 = vpop.xlane.xlu1 %266 }
 0x27f   :  { %1111 = vrcp.f32 %v267_v4 }
 0x280   :  { %v338_v5 = vpop.xlane.xlu0 %337 }
 0x281   :  { %1113 = vrcp.f32 %v338_v5 }
 0x282   :  { %v341_v6 = vpop.xlane.xlu1 %340  ;;  %v1106_v8 = vpop.eup %1105 }
 0x283   :  { %1115 = vrcp.f32 %v341_v6  ;;  %v272_v11 = vmul.f32 %v1106_v8, %v1090_v40  ;;  %v1313_v40 = vrot.slane %v43_v37, %v1247_v26 }
 0x284   :  { %v344_v7 = vpop.xlane.xlu0 %343 }
 0x285   :  { %1117 = vrcp.f32 %v344_v7 }
 0x287   :  { %v347_v9 = vpop.xlane.xlu1 %346 }
 0x288   :  { %v1108_v10 = vpop.eup %1107  ;;  %1119 = vrcp.f32 %v347_v9 }
 0x289   :  { %v273_v12 = vmul.f32 %v1108_v10, %v1094_v51  ;;  %v1110_v13 = vpop.eup %1109 }
 0x28a   :  { %v274_v17 = vmul.f32 %v1110_v13, %v1092_v46 }
 0x28b   :  { %v356_v14 = vpack.c.bf16 %v273_v12, %v272_v11  ;;  %v555_v12 = vpop.trf.xlu0 }
 0x28c   :  { %v1112_v16 = vpop.eup %1111 }
 0x28d   :  { %1029 = vmatprep.mubr.msk.bf16.mxu0 %vm231_vm2, %v356_v14  ;;  %v275_v18 = vmul.f32 %v1112_v16, %v1096_v53 }
 0x28e   :  { %v1114_v19 = vpop.eup %1113 }
 0x28f   :  { %v357_v20 = vpack.c.bf16 %v275_v18, %v274_v17  ;;  %v352_v23 = vmul.f32 %v1114_v19, %v1100_v56 }
 0x290   :  { %v1116_v21 = vpop.eup %1115 }
 0x291   :  { %1030 = vmatmul.mubr.msk.bf16.vlgmr.msra.gmra.mxu0 %vm231_vm2, %v357_v20  ;;  %v353_v24 = vmul.f32 %v1116_v21, %v1098_v54 }
 0x292   :  { %v1118_v25 = vpop.eup %1117 }
 0x293   :  { %v358_v27 = vpack.c.bf16 %v353_v24, %v352_v23  ;;  %v354_v29 = vmul.f32 %v1118_v25, %v1102_v59 }
 0x295   :  { %v1120_v28 = vpop.eup %1119  ;;  %1033 = vmatprep.mubr.msk.bf16.mxu0 %vm231_vm2, %v358_v27 }
 0x296   :  { %v355_v30 = vmul.f32 %v1120_v28, %v1104_v61 }
 0x298   :  { %v359_v31 = vpack.c.bf16 %v355_v30, %v354_v29 }
 0x29a   :  { %1034 = vmatmul.mubr.msk.bf16.gmra.mxu0 %vm231_vm2, %v359_v31 }
 0x29b   :  { %1047 = vmatprep.mubr.msk.bf16.mxu0 %vm1154_vm1, %v1153_v1 }
 0x351   :  { %v1031_v35 = vpop.f32.mrf.mxu0 }
 0x352   :  { %v443_v44 = vmul.f32 %v1031_v35, %v1310_v39 }
 0x353   :  { %v406_v36 = vpop.f32.mrf.mxu0 }
 0x354   :  { %v441_v47 = vmul.f32 %v1310_v39, %v406_v36 }
 0x355   :  { %v1032_v38 = vpop.f32.mrf.mxu0 }
 0x356   :  { %v444_v54 = vmul.f32 %v1032_v38, %v1310_v39 }
 0x357   :  { %v409_v42 = vpop.f32.mrf.mxu0 }
 0x358   :  { %v442_v58 = vmul.f32 %v1310_v39, %v409_v42 }
 0x35a   :  { %v1035_v43 = vpop.f32.mrf.mxu0 }
 0x35b   :  { %v451_v45 = vmul.f32 %v1035_v43, %v1313_v40 }
 0x35c   :  { %v422_v46 = vpop.f32.mrf.mxu0 }
 0x35d   :  { %v455_v48 = vadd.f32 %v451_v45, %v443_v44  ;;  %v449_v51 = vmul.f32 %v1313_v40, %v422_v46 }
 0x35e   :  { %v1036_v53 = vpop.f32.mrf.mxu0 }
 0x35f   :  { %v453_v55 = vadd.f32 %v449_v51, %v441_v47  ;;  %v452_v56 = vmul.f32 %v1036_v53, %v1313_v40  ;;  %v466_v59 = vadd.f32 %v969_v52, %v455_v48 }
 0x360   :  { %v425_v57 = vpop.f32.mrf.mxu0 }
 0x361   :  { %v456_v60 = vadd.f32 %v452_v56, %v444_v54  ;;  %v450_v61 = vmul.f32 %v1313_v40, %v425_v57  ;;  %v464_v62 = vadd.f32 %v969_v52, %v453_v55  ;;  %v470_v2 = vmax.f32 %v466_v59, 0.0 }
 0x363   :  { %v467_v63 = vadd.f32 %v969_v52, %v456_v60  ;;  %v454_v0 = vadd.f32 %v450_v61, %v442_v58  ;;  %v468_v6 = vmax.f32 %v464_v62, 0.0 }
 0x365   :  { %v471_v4 = vmax.f32 %v467_v63, 0.0  ;;  %v465_v5 = vadd.f32 %v969_v52, %v454_v0 }
 0x367   :  { %v469_v7 = vmax.f32 %v465_v5, 0.0  ;;  %v473_v8 = vpack.c.bf16 %v471_v4, %v470_v2 }
 0x369   :  { %v472_v9 = vpack.c.bf16 %v469_v7, %v468_v6  ;;  %v486_v10 = vsel %vm66_vm0, %v473_v8, 0 }
 0x36a   :  { %1044 = vmatpush3.bf16.xpose.msra.mxu0 %v486_v10 }
 0x36b   :  { %1039 = vmatprep.mubr.msk.bf16.mxu1 %vm66_vm0, %v472_v9  ;;  %1045 = vmatprep.subr.bf16.mxu0 %v1153_v1  ;;  %v483_v11 = vsel %vm66_vm0, %v472_v9, 0 }
 0x36c   :  { %1040 = vmatmul.mubr.msk.bf16.vlgmr.msra.gmra.mxu1 %vm66_vm0, %v473_v8 }
 0x372   :  { %1046 = vmatpush3.bf16.xpose.msra.mxu0 %v483_v11 }
 0x379   :  { %1048 = vmatmul.mubr.msk.bf16.vlgmr.msra.gmra.mxu0 %vm66_vm0, %v555_v12 }
 0x42c   :  { %v1041_v13 = vpop.f32.mrf.mxu1 }
 0x42d   :  { %618 = vperm.xlu1 %1078, %v1041_v13  }
 0x42e   :  { %v522_v14 = vpop.f32.mrf.mxu1 }
 0x430   :  { %v1042_v16 = vpop.f32.mrf.mxu1 }
 0x431   :  { %v538_v17 = vpack.c.bf16 %v1042_v16, %v1041_v13  ;;  %608 = vperm.xlu1 %1078, %v522_v14  }
 0x432   :  { %v525_v18 = vpop.f32.mrf.mxu1 }
 0x433   :  { %v537_v19 = vpack.c.bf16 %v525_v18, %v522_v14  ;;  %1051 = vmatprep.subr.bf16.mxu1 %v538_v17 }
 0x434   :  { %1052 = vmatpush3.bf16.msra.mxu1 %v538_v17 }
 0x435   :  { %1079 = vset.pattern.permute.xlu1 %v1156_v15  ;;  %1053 = vmatprep.subr.bf16.mxu1 %v537_v19 }
 0x436   :  { %691 = vperm.xlu1 %1079, %v522_v14  }
 0x438   :  { %1054 = vmatpush3.bf16.msra.mxu1 %v537_v19 }
 0x439   :  { %v600_v1 = vpop.f32.mrf.mxu0 }
 0x43a   :  { %1080 = vset.pattern.permute.xlu1 %v1155_v3  ;;  %v629_v24 = vrot.slane %v600_v1, %v1244_v22  ;;  %v709_v3 = vrot.slane %v600_v1, %v1247_v26 }
 0x43b   :  { %623 = vperm.xlu1 %1080, %v1042_v16   ;;  %v1049_v20 = vpop.f32.mrf.mxu0 }
 0x43d   :  { %v603_v21 = vpop.f32.mrf.mxu0 }
 0x43f   :  { %613 = vperm.xlu1 %1080, %v525_v18   ;;  %v1050_v23 = vpop.f32.mrf.mxu0 }
 0x443   :  { %1081 = vset.pattern.permute.xlu1 %v1156_v15 }
 0x444   :  { %699 = vperm.xlu1 %1081, %v1041_v13  }
 0x448   :  { %695 = vperm.xlu1 %1081, %v525_v18  }
 0x44c   :  { %703 = vperm.xlu1 %1081, %v1042_v16  }
 0x4a8   :  { %v619_v25 = vpop.permute.xlu1 %618 }
 0x4a9   :  { %v632_v27 = vadd.f32 %v629_v24, %v619_v25 }
 0x4ab   :  { %v636_v29 = vmul.f32 0.2, %v632_v27 }
 0x4ac   :  { %v609_v28 = vpop.permute.xlu1 %608 }
 0x4ad   :  { %v630_v30 = vadd.f32 %v629_v24, %v609_v28  ;;  %v640_v32 = vmax.f32 %v632_v27, %v636_v29 }
 0x4af   :  { %v634_v31 = vmul.f32 0.2, %v630_v30  ;;  %v644_v38 = vadd.f32 %v640_v32, %v1258_v41 }
 0x4b1   :  { %v638_v33 = vmax.f32 %v630_v30, %v634_v31  ;;  %v692_v35 = vpop.permute.xlu1 %691  ;;  %v652_v45 = vsel %vm231_vm2, %v644_v38, -inf }
 0x4b2   :  { %v710_v36 = vadd.f32 %v709_v3, %v692_v35 }
 0x4b3   :  { %v642_v37 = vadd.f32 %v638_v33, %v1253_v34 }
 0x4b4   :  { %v714_v42 = vmul.f32 0.2, %v710_v36 }
 0x4b5   :  { %v646_v15 = vsel %vm231_vm2, %v642_v37, -inf }
 0x4b6   :  { %647 = vmax.xlane.f32.xlu0 %v646_v15  ;;  %v624_v22 = vpop.permute.xlu1 %623  ;;  %v718_v26 = vmax.f32 %v710_v36, %v714_v42 }
 0x4b7   :  { %v633_v43 = vadd.f32 %v629_v24, %v624_v22 }
 0x4b8   :  { %v722_v56 = vadd.f32 %v718_v26, %v1253_v34 }
 0x4b9   :  { %v637_v44 = vmul.f32 0.2, %v633_v43 }
 0x4ba   :  { %653 = vmax.xlane.f32.xlu0 %v652_v45  ;;  %v614_v46 = vpop.permute.xlu1 %613  ;;  %v726_v61 = vsel %vm231_vm2, %v722_v56, -inf }
 0x4bb   :  { %v641_v47 = vmax.f32 %v633_v43, %v637_v44  ;;  %v631_v48 = vadd.f32 %v629_v24, %v614_v46 }
 0x4bd   :  { %v635_v51 = vmul.f32 0.2, %v631_v48  ;;  %v645_v52 = vadd.f32 %v641_v47, %v1271_v50 }
 0x4bf   :  { %v639_v53 = vmax.f32 %v631_v48, %v635_v51  ;;  %v700_v54 = vpop.permute.xlu1 %699  ;;  %v655_v55 = vsel %vm231_vm2, %v645_v52, -inf }
 0x4c0   :  { %v712_v57 = vadd.f32 %v709_v3, %v700_v54  ;;  %656 = vmax.xlane.f32.xlu0 %v655_v55 }
 0x4c1   :  { %v643_v58 = vadd.f32 %v639_v53, %v1266_v49 }
 0x4c2   :  { %v716_v59 = vmul.f32 0.2, %v712_v57 }
 0x4c3   :  { %v696_v60 = vpop.permute.xlu1 %695  ;;  %v649_v62 = vsel %vm231_vm2, %v643_v58, -inf }
 0x4c4   :  { %v720_v63 = vmax.f32 %v712_v57, %v716_v59  ;;  %v711_v0 = vadd.f32 %v709_v3, %v696_v60  ;;  %727 = vmax.xlane.f32.xlu0 %v726_v61  ;;  %650 = vmax.xlane.f32.xlu1 %v649_v62 }
 0x4c6   :  { %v715_v2 = vmul.f32 0.2, %v711_v0  ;;  %v724_v4 = vadd.f32 %v720_v63, %v1258_v41 }
 0x4c7   :  { %v704_v5 = vpop.permute.xlu1 %703 }
 0x4c8   :  { %v719_v6 = vmax.f32 %v711_v0, %v715_v2  ;;  %v713_v34 = vadd.f32 %v709_v3, %v704_v5  ;;  %v732_v7 = vsel %vm231_vm2, %v724_v4, -inf }
 0x4c9   :  { %733 = vmax.xlane.f32.xlu0 %v732_v7 }
 0x4ca   :  { %v717_v8 = vmul.f32 0.2, %v713_v34  ;;  %v723_v9 = vadd.f32 %v719_v6, %v1266_v49 }
 0x4cc   :  { %v721_v10 = vmax.f32 %v713_v34, %v717_v8  ;;  %v729_v11 = vsel %vm231_vm2, %v723_v9, -inf }
 0x4cd   :  { %730 = vmax.xlane.f32.xlu0 %v729_v11 }
 0x4ce   :  { %v725_v12 = vadd.f32 %v721_v10, %v1271_v50 }
 0x4d0   :  { %v735_v13 = vsel %vm231_vm2, %v725_v12, -inf }
 0x4d1   :  { %736 = vmax.xlane.f32.xlu0 %v735_v13 }
 0x53f   :  { %v648_v14 = vpop.xlane.xlu0 %647 }
 0x540   :  { %v658_v41 = vsub.f32 %v642_v37, %v648_v14 }
 0x542   :  { %v662_v16 = vmul.f32 1.442695, %v658_v41 }
 0x543   :  { %v654_v17 = vpop.xlane.xlu0 %653 }
 0x544   :  { %1121 = vpow2.f32 %v662_v16  ;;  %v660_v18 = vsub.f32 %v644_v38, %v654_v17 }
 0x546   :  { %v666_v19 = vmul.f32 1.442695, %v660_v18 }
 0x548   :  { %1123 = vpow2.f32 %v666_v19 }
 0x549   :  { %v657_v1 = vpop.xlane.xlu0 %656 }
 0x54a   :  { %v661_v20 = vsub.f32 %v645_v52, %v657_v1  ;;  %v1088_v1 = vld [vmem:[%s1404_s9] sm:$0xff]  }
 0x54b   :  { %1063 = vmatprep.subr.bf16.mxu0 %v1088_v1 }
 0x54c   :  { %v668_v28 = vmul.f32 1.442695, %v661_v20  ;;  %1064 = vmatpush3.bf16.msra.mxu0 %v1088_v1 }
 0x54d   :  { %v728_v49 = vpop.xlane.xlu0 %727  ;;  %v651_v21 = vpop.xlane.xlu1 %650 }
 0x54e   :  { %v738_v23 = vsub.f32 %v722_v56, %v728_v49  ;;  %v659_v24 = vsub.f32 %v643_v58, %v651_v21 }
 0x550   :  { %v742_v25 = vmul.f32 1.442695, %v738_v23  ;;  %v664_v27 = vmul.f32 1.442695, %v659_v24 }
 0x551   :  { %v1122_v50 = vpop.eup %1121 }
 0x552   :  { %1125 = vpow2.f32 %v742_v25  ;;  %v734_v29 = vpop.xlane.xlu0 %733  ;;  %v670_v30 = vsel %vm231_vm2, %v1122_v50, 0.0 }
 0x553   :  { %1127 = vpow2.f32 %v664_v27  ;;  %v740_v31 = vsub.f32 %v724_v4, %v734_v29  ;;  %671 = vadd.xlane.f32.xlu1 %v670_v30 }
 0x554   :  { %1129 = vpow2.f32 %v668_v28 }
 0x555   :  { %v1124_v3 = vpop.eup %1123  ;;  %v746_v32 = vmul.f32 1.442695, %v740_v31 }
 0x556   :  { %v731_v33 = vpop.xlane.xlu0 %730  ;;  %v676_v35 = vsel %vm231_vm2, %v1124_v3, 0.0 }
 0x557   :  { %1131 = vpow2.f32 %v746_v32  ;;  %v739_v36 = vsub.f32 %v723_v9, %v731_v33  ;;  %677 = vadd.xlane.f32.xlu1 %v676_v35 }
 0x559   :  { %v744_v37 = vmul.f32 1.442695, %v739_v36 }
 0x55a   :  { %v737_v15 = vpop.xlane.xlu0 %736 }
 0x55b   :  { %1133 = vpow2.f32 %v744_v37  ;;  %v741_v38 = vsub.f32 %v725_v12, %v737_v15  ;;  %v979_v37 = vld [vmem:[%s1405_s8] ss:$0 sm:$0xff] }
 0x55d   :  { %v748_v22 = vmul.f32 1.442695, %v741_v38 }
 0x55f   :  { %v1126_v42 = vpop.eup %1125  ;;  %1135 = vpow2.f32 %v748_v22 }
 0x560   :  { %v1128_v43 = vpop.eup %1127  ;;  %v750_v44 = vsel %vm231_vm2, %v1126_v42, 0.0 }
 0x561   :  { %751 = vadd.xlane.f32.xlu1 %v750_v44  ;;  %v673_v45 = vsel %vm231_vm2, %v1128_v43, 0.0  ;;  %v1130_v46 = vpop.eup %1129 }
 0x562   :  { %674 = vadd.xlane.f32.xlu0 %v673_v45  ;;  %v679_v47 = vsel %vm231_vm2, %v1130_v46, 0.0 }
 0x564   :  { %v1132_v26 = vpop.eup %1131 }
 0x565   :  { %v756_v48 = vsel %vm231_vm2, %v1132_v26, 0.0 }
 0x566   :  { %680 = vadd.xlane.f32.xlu0 %v679_v47  ;;  %757 = vadd.xlane.f32.xlu1 %v756_v48 }
 0x568   :  { %v1134_v51 = vpop.eup %1133 }
 0x569   :  { %v753_v52 = vsel %vm231_vm2, %v1134_v51, 0.0 }
 0x56a   :  { %754 = vadd.xlane.f32.xlu0 %v753_v52 }
 0x56c   :  { %v1136_v53 = vpop.eup %1135 }
 0x56d   :  { %v759_v54 = vsel %vm231_vm2, %v1136_v53, 0.0 }
 0x56e   :  { %760 = vadd.xlane.f32.xlu0 %v759_v54 }
 0x5dc   :  { %v672_v55 = vpop.xlane.xlu1 %671 }
 0x5dd   :  { %1137 = vrcp.f32 %v672_v55 }
 0x5e0   :  { %v678_v56 = vpop.xlane.xlu1 %677 }
 0x5ea   :  { %v752_v58 = vpop.xlane.xlu1 %751  ;;  %v1138_v62 = vpop.eup %1137 }
 0x5eb   :  { %v675_v57 = vpop.xlane.xlu0 %674  ;;  %v686_v2 = vmul.f32 %v1138_v62, %v1122_v50 }
 0x5ec   :  { %1139 = vrcp.f32 %v675_v57 }
 0x5ed   :  { %1141 = vrcp.f32 %v678_v56 }
 0x5ef   :  { %v681_v59 = vpop.xlane.xlu0 %680  ;;  %v758_v60 = vpop.xlane.xlu1 %757 }
 0x5f0   :  { %1143 = vrcp.f32 %v681_v59 }
 0x5f1   :  { %1145 = vrcp.f32 %v752_v58 }
 0x5f3   :  { %v755_v61 = vpop.xlane.xlu0 %754 }
 0x5f4   :  { %1147 = vrcp.f32 %v755_v61 }
 0x5f5   :  { %1149 = vrcp.f32 %v758_v60 }
 0x5f7   :  { %v761_v63 = vpop.xlane.xlu0 %760 }
 0x5f8   :  { %1151 = vrcp.f32 %v761_v63 }
 0x5f9   :  { %v1140_v0 = vpop.eup %1139 }
 0x5fa   :  { %v687_v4 = vmul.f32 %v1140_v0, %v1128_v43  ;;  %v1142_v5 = vpop.eup %1141 }
 0x5fb   :  { %v688_v7 = vmul.f32 %v1142_v5, %v1124_v3 }
 0x5fc   :  { %v770_v6 = vpack.c.bf16 %v687_v4, %v686_v2 }
 0x5fd   :  { %v1144_v34 = vpop.eup %1143 }
 0x5fe   :  { %1055 = vmatprep.mubr.msk.bf16.mxu1 %vm231_vm2, %v770_v6  ;;  %v689_v8 = vmul.f32 %v1144_v34, %v1130_v46  ;;  %v1146_v9 = vpop.eup %1145 }
 0x5ff   :  { %v766_v12 = vmul.f32 %v1146_v9, %v1126_v42 }
 0x600   :  { %v771_v10 = vpack.c.bf16 %v689_v8, %v688_v7 }
 0x601   :  { %v1148_v11 = vpop.eup %1147 }
 0x602   :  { %1056 = vmatmul.mubr.msk.bf16.vlgmr.msra.gmra.mxu1 %vm231_vm2, %v771_v10  ;;  %v767_v13 = vmul.f32 %v1148_v11, %v1134_v51  ;;  %v1150_v14 = vpop.eup %1149 }
 0x603   :  { %v768_v17 = vmul.f32 %v1150_v14, %v1132_v26 }
 0x604   :  { %v772_v41 = vpack.c.bf16 %v767_v13, %v766_v12 }
 0x605   :  { %v1152_v16 = vpop.eup %1151 }
 0x606   :  { %1059 = vmatprep.mubr.msk.bf16.mxu1 %vm231_vm2, %v772_v41  ;;  %v769_v18 = vmul.f32 %v1152_v16, %v1136_v53 }
 0x608   :  { %v773_v19 = vpack.c.bf16 %v769_v18, %v768_v17 }
 0x60a   :  { %1060 = vmatmul.mubr.msk.bf16.gmra.mxu1 %vm231_vm2, %v773_v19 }
 0x6c2   :  { %v1057_v20 = vpop.f32.mrf.mxu1 }
 0x6c3   :  { %v853_v29 = vmul.f32 %v1057_v20, %v1310_v39 }
 0x6c4   :  { %v820_v49 = vpop.f32.mrf.mxu1 }
 0x6c5   :  { %v851_v50 = vmul.f32 %v820_v49, %v1310_v39 }
 0x6c6   :  { %v1058_v21 = vpop.f32.mrf.mxu1 }
 0x6c7   :  { %v854_v31 = vmul.f32 %v1058_v21, %v1310_v39 }
 0x6c8   :  { %v823_v23 = vpop.f32.mrf.mxu1 }
 0x6c9   :  { %v852_v36 = vmul.f32 %v823_v23, %v1310_v39  ;;  %v980_v39 = vld [vmem:[%s1406_s10] ss:$0 sm:$0xff] }
 0x6ca   :  { %v1061_v24 = vpop.f32.mrf.mxu1 }
 0x6cb   :  { %v857_v25 = vmul.f32 %v1061_v24, %v1313_v40 }
 0x6cc   :  { %v836_v27 = vpop.f32.mrf.mxu1 }
 0x6cd   :  { %v855_v28 = vmul.f32 %v836_v27, %v1313_v40  ;;  %v861_v33 = vadd.f32 %v857_v25, %v853_v29 }
 0x6ce   :  { %v1062_v30 = vpop.f32.mrf.mxu1 }
 0x6cf   :  { %v859_v3 = vadd.f32 %v855_v28, %v851_v50  ;;  %v858_v32 = vmul.f32 %v1062_v30, %v1313_v40  ;;  %v872_v44 = vadd.f32 %v979_v37, %v861_v33 }
 0x6d0   :  { %v839_v35 = vpop.f32.mrf.mxu1 }
 0x6d1   :  { %v862_v15 = vadd.f32 %v858_v32, %v854_v31  ;;  %v856_v38 = vmul.f32 %v839_v35, %v1313_v40  ;;  %v870_v22 = vadd.f32 %v979_v37, %v859_v3  ;;  %v876_v48 = vmax.f32 %v872_v44, 0.0 }
 0x6d3   :  { %v873_v42 = vadd.f32 %v979_v37, %v862_v15  ;;  %v860_v43 = vadd.f32 %v856_v38, %v852_v36  ;;  %v874_v26 = vmax.f32 %v870_v22, 0.0 }
 0x6d5   :  { %v871_v45 = vadd.f32 %v979_v37, %v860_v43  ;;  %v877_v46 = vmax.f32 %v873_v42, 0.0 }
 0x6d7   :  { %v875_v47 = vmax.f32 %v871_v45, 0.0  ;;  %v879_v52 = vpack.c.bf16 %v877_v46, %v876_v48 }
 0x6d9   :  { %v878_v51 = vpack.c.bf16 %v875_v47, %v874_v26 }
 0x6db   :  { %1065 = vmatprep.mubr.msk.bf16.mxu0 %vm66_vm0, %v878_v51 }
 0x6dc   :  { %1066 = vmatmul.mubr.msk.bf16.vlgmr.msra.gmra.mxu0 %vm66_vm0, %v879_v52 }
 0x79c   :  { %v1067_v40 = vpop.f32.mrf.mxu0 }
 0x79d   :  { %v944_v53 = vadd.f32 %v1067_v40, %v980_v39 }
 0x79e   :  { %v935_v54 = vpop.f32.mrf.mxu0 }
 0x79f   :  { %952 = vst [vmem:[%s1407_s11 + $0x10] sm:$0xff] %v944_v53  ;;  %v936_v55 = vadd.f32 %v980_v39, %v935_v54 }
 0x7a0   :  { %v1068_v56 = vpop.f32.mrf.mxu0 }
 0x7a1   :  { %950 = vst [vmem:[%s1407_s11] sm:$0xff] %v936_v55  ;;  %v947_v57 = vadd.f32 %v1068_v56, %v980_v39 }
 0x7a2   :  { %v938_v58 = vpop.f32.mrf.mxu0 }
 0x7a3   :  { %953 = vst [vmem:[%s1407_s11 + $0x18] sm:$0xff] %v947_v57  ;;  %v939_v59 = vadd.f32 %v980_v39, %v938_v58 }
 0x7a5   :  { %951 = vst [vmem:[%s1407_s11 + $0x8] sm:$0xff] %v939_v59 }

</bundles_post_ra>
